<compile_context>
chip_gen: v7x
topology: tpu7x:2x2x1
jax: 0.10.0
libtpu: 0.0.40
codegen_flags: <defaults>
</compile_context>

<pallas_src>
import jax
import jax.numpy as jnp
from jax.experimental import pallas as pl
from jax.experimental.pallas import tpu as pltpu

K, S, P = 4, 2, 1  # kernel_size, stride, padding of InConv


def in_conv_kernel(w_ref, x_ref, o_ref):
    # w_ref: (Cout, K*K*Cin)   constant block index -> stays VMEM resident
    # x_ref: (K*K*Cin, tile_n) im2col columns for this (batch, spatial tile)
    # o_ref: (Cout, tile_n)    lane-dense output tile (already NCHW-flat)
    o_ref[...] = jnp.dot(
        w_ref[...], x_ref[...], preferred_element_type=jnp.float32
    ).astype(o_ref.dtype)


def _round_up(x, m):
    return (x + m - 1) // m * m


def _cdiv(a, b):
    return -(-a // b)


def _pick_tile_n(n_eff, b_eff, per_lane_bytes, w_bytes, block_budget, min_grid_steps):
    """Largest multiple-of-128 lane tile that fits the VMEM block budget, then
    shrunk (floors 512 / 256) until there are enough grid steps for megacore +
    pipeline overlap."""
    avail = max(block_budget - 2 * w_bytes, 128 * per_lane_bytes)
    tile = max(128, (avail // per_lane_bytes) // 128 * 128)
    tile = min(tile, _round_up(n_eff, 128))
    # Prefer >= min_grid_steps steps, but keep tiles >= 512 lanes (~85% HBM roofline).
    while tile > 512 and b_eff * _cdiv(n_eff, tile) < min_grid_steps:
        tile = max(512, _round_up(tile // 2, 128))
    # At minimum try for 2 steps (v7x has 2 TensorCores), never below 256 for it.
    while tile > 256 and b_eff * _cdiv(n_eff, tile) < 2:
        tile = max(256, _round_up(tile // 2, 128))
    return tile


def in_conv_forward(
    x_nchw,
    weight,
    *,
    compute_dtype=jnp.bfloat16,          # streamed-operand dtype (f32 accumulation)
    vmem_block_budget=32 * 1024 * 1024,  # budget for double-buffered x + out blocks
    vmem_limit_bytes=48 * 1024 * 1024,   # explicit scoped-VMEM limit
    min_grid_steps=4,
):
    """Forward pass of InConv. x_nchw: (B, Cin, H, W), weight (OIHW): (Cout, Cin, 4, 4)."""
    B, Cin, H, W = x_nchw.shape
    Cout = weight.shape[0]
    OH = (H + 2 * P - K) // S + 1
    OW = (W + 2 * P - K) // S + 1
    N = OH * OW
    KKC = K * K * Cin
    out_dtype = x_nchw.dtype

    # --- glue (pure data movement; tagged for input fusion into the Pallas op) ---
    x_pad = jnp.pad(x_nchw, ((0, 0), (0, 0), (P, P), (P, P))).astype(compute_dtype)
    taps = [
        x_pad[:, :, kh:kh + S * OH:S, kw:kw + S * OW:S].reshape(B, Cin, N)
        for kh in range(K)
        for kw in range(K)
    ]
    # (B, 16, Cin, N) -> (B, 16*Cin, N): contraction index = (kh*K + kw)*Cin + cin
    x_cols = jnp.stack(taps, axis=1).reshape(B, KKC, N)
    # OIHW -> (Cout, K, K, Cin) -> (Cout, K*K*Cin): same contraction ordering.
    w_flat = jnp.transpose(weight, (0, 2, 3, 1)).reshape(Cout, KKC).astype(compute_dtype)

    # Small feature maps: fold batch into the lane dim so the output last dim >= 128.
    fold_batch = (N < 128) and (B > 1)
    if fold_batch:
        x_eff = jnp.transpose(x_cols, (1, 0, 2)).reshape(1, KKC, B * N)
        B_eff, N_eff = 1, B * N
    else:
        x_eff, B_eff, N_eff = x_cols, B, N

    # --- VMEM-budget-aware, megacore-aware spatial tiling + lane padding ---------
    x_item = jnp.dtype(compute_dtype).itemsize
    out_item = jnp.dtype(out_dtype).itemsize
    per_lane = 2 * KKC * x_item + 2 * Cout * out_item   # double-buffered x + out
    w_bytes = Cout * KKC * x_item
    tile_n = _pick_tile_n(N_eff, B_eff, per_lane, w_bytes, vmem_block_budget,
                          min_grid_steps)
    Np = _round_up(N_eff, tile_n)
    if Np != N_eff:
        x_eff = jnp.pad(x_eff, ((0, 0), (0, 0), (0, Np - N_eff)))
    grid = (B_eff, Np // tile_n)
    vmem_limit = int(max(vmem_limit_bytes, 2 * w_bytes + per_lane * tile_n + (4 << 20)))

    def _run(single_buffer_weight):
        w_idx = lambda b, n: (0, 0)
        if single_buffer_weight:
            # Constant block index -> no need to double-buffer the weight.
            w_spec = pl.BlockSpec((Cout, KKC), w_idx, pipeline_mode=pl.Buffered(1))
        else:
            w_spec = pl.BlockSpec((Cout, KKC), w_idx)
        return pl.pallas_call(
            in_conv_kernel,
            out_shape=jax.ShapeDtypeStruct((B_eff, Cout, Np), out_dtype),
            grid=grid,
            in_specs=[
                w_spec,
                pl.BlockSpec((None, KKC, tile_n), lambda b, n: (b, 0, n)),
            ],
            out_specs=pl.BlockSpec((None, Cout, tile_n), lambda b, n: (b, 0, n)),
            compiler_params=pltpu.CompilerParams(
                dimension_semantics=("parallel", "parallel"),
                vmem_limit_bytes=vmem_limit,
                allow_input_fusion=[1],   # fuse the im2col producer into operand 1
            ),
        )(w_flat, x_eff)

    try:
        out_flat = _run(True)
    except Exception:
        # Fallback if single-buffered pipeline_mode is unsupported on this JAX build.
        out_flat = _run(False)

    # Un-pad / un-fold. Output is already NCHW-flat -> reshape only in the common case.
    if fold_batch:
        out = out_flat[0, :, : B * N].reshape(Cout, B, N).transpose(1, 0, 2)
    else:
        out = out_flat[:, :, :N]
    return out.reshape(B, Cout, OH, OW)


if __name__ == "__main__":
    # Small shapes consistent with the module: batch=2, in_channels=4,
    # spatial=16x16, out_channels=8.
    B, Cin, H, W = 2, 4, 16, 16
    Cout = 8

    key = jax.random.PRNGKey(0)
    kx, kw = jax.random.split(key)
    x = jax.random.normal(kx, (B, Cin, H, W), dtype=jnp.float32)
    weight = 0.1 * jax.random.normal(kw, (Cout, Cin, 4, 4), dtype=jnp.float32)

    # High-precision XLA reference for semantics validation.
    ref = jax.lax.conv_general_dilated(
        x, weight,
        window_strides=(S, S),
        padding=((P, P), (P, P)),
        dimension_numbers=("NCHW", "OIHW", "NCHW"),
        precision=jax.lax.Precision.HIGHEST,
    )

    # f32 streaming path (exactness check).
    y32 = jax.block_until_ready(in_conv_forward(x, weight, compute_dtype=jnp.float32))
    assert y32.shape == ref.shape == (B, Cout, H // 2, W // 2)
    assert jnp.allclose(y32, ref, atol=2e-2, rtol=2e-2)

    # Default perf path: bf16 streaming, f32 accumulation (documented numeric delta).
    y = jax.block_until_ready(in_conv_forward(x, weight))
    assert y.shape == ref.shape
    assert jnp.allclose(y, ref, atol=5e-2, rtol=5e-2)

    print("KERNEL_OK")
</pallas_src>

<mosaic_0001>
module attributes {stable_mosaic.version = 11 : i64} {
  func.func @in_conv_kernel(%arg0: i32, %arg1: i32, %arg2: memref<8x64xf32, #tpu.memory_space<vmem>>, %arg3: memref<1x64x128xf32, #tpu.memory_space<vmem>>, %arg4: memref<1x8x128xf32, #tpu.memory_space<vmem>>) attributes {dimension_semantics = [#tpu.dimension_semantics<parallel>, #tpu.dimension_semantics<parallel>], iteration_bounds = array<i64: 1, 1>, scalar_prefetch = 0 : i64, scratch_operands = 0 : i64, tpu.core_type = #tpu.core_type<tc>, window_params = [{pipeline_mode = #tpu.pipeline_mode<synchronous>, transform_indices = @transform_0, window_bounds = array<i64: 8, 64>}, {transform_indices = @transform_1, window_bounds = array<i64: 1, 64, 128>}, {transform_indices = @transform_2, window_bounds = array<i64: 1, 8, 128>}]} {
    %c0 = arith.constant 0 : index
    %c0_0 = arith.constant 0 : index
    %0 = vector.load %arg2[%c0, %c0_0] : memref<8x64xf32, #tpu.memory_space<vmem>>, vector<8x64xf32>
    %c0_1 = arith.constant 0 : index
    %c0_2 = arith.constant 0 : index
    %c0_3 = arith.constant 0 : index
    %1 = vector.load %arg3[%c0_1, %c0_2, %c0_3] : memref<1x64x128xf32, #tpu.memory_space<vmem>>, vector<1x64x128xf32>
    %2 = vector.shape_cast %1 : vector<1x64x128xf32> to vector<64x128xf32>
    %cst = arith.constant dense<0.000000e+00> : vector<8x128xf32>
    %3 = tpu.matmul %0, %2, %cst {dimension_numbers = #tpu.dot_dimension_numbers<[1], [0], [0], [1], [0, 0, 1, 1], [], []>} : vector<8x64xf32>, vector<64x128xf32>, vector<8x128xf32> -> vector<8x128xf32>
    %c0_4 = arith.constant 0 : index
    %c0_5 = arith.constant 0 : index
    %c0_6 = arith.constant 0 : index
    %4 = vector.load %arg4[%c0_4, %c0_5, %c0_6] : memref<1x8x128xf32, #tpu.memory_space<vmem>>, vector<1x8x128xf32>
    %5 = vector.shape_cast %4 : vector<1x8x128xf32> to vector<8x128xf32>
    %6 = vector.shape_cast %3 : vector<8x128xf32> to vector<1x8x128xf32>
    tpu.vector_store %arg4[%c0_4, %c0_5, %c0_6], %6 {strides = array<i32>} : memref<1x8x128xf32, #tpu.memory_space<vmem>>, vector<1x8x128xf32>,
    return
  }
  func.func @transform_0(%arg0: i32, %arg1: i32) -> (i32, i32) {
    %c0_i32 = arith.constant 0 : i32
    %c0_i32_0 = arith.constant 0 : i32
    %c0_i32_1 = arith.constant 0 : i32
    return %c0_i32, %c0_i32_0 : i32, i32
  }
  func.func @transform_1(%arg0: i32, %arg1: i32) -> (i32, i32, i32) {
    %c0_i32 = arith.constant 0 : i32
    %c0_i32_0 = arith.constant 0 : i32
    return %arg0, %c0_i32, %arg1 : i32, i32, i32
  }
  func.func @transform_2(%arg0: i32, %arg1: i32) -> (i32, i32, i32) {
    %c0_i32 = arith.constant 0 : i32
    %c0_i32_0 = arith.constant 0 : i32
    return %arg0, %c0_i32, %arg1 : i32, i32, i32
  }
}

module attributes {stable_mosaic.version = 11 : i64} {
  func.func @in_conv_kernel(%arg0: i32, %arg1: i32, %arg2: memref<8x64xf32, #tpu.memory_space<vmem>>, %arg3: memref<1x64x128xf32, #tpu.memory_space<vmem>>, %arg4: memref<1x8x128xf32, #tpu.memory_space<vmem>>) attributes {dimension_semantics = [#tpu.dimension_semantics<parallel>, #tpu.dimension_semantics<parallel>], iteration_bounds = array<i64: 1, 1>, scalar_prefetch = 0 : i64, scratch_operands = 0 : i64, tpu.core_type = #tpu.core_type<tc>, window_params = [{pipeline_mode = #tpu.pipeline_mode<synchronous>, transform_indices = @transform_0, window_bounds = array<i64: 8, 64>}, {transform_indices = @transform_1, window_bounds = array<i64: 1, 64, 128>}, {transform_indices = @transform_2, window_bounds = array<i64: 1, 8, 128>}]} {
    %c0 = arith.constant 0 : index
    %c0_0 = arith.constant 0 : index
    %0 = vector.load %arg2[%c0, %c0_0] : memref<8x64xf32, #tpu.memory_space<vmem>>, vector<8x64xf32>
    %c0_1 = arith.constant 0 : index
    %c0_2 = arith.constant 0 : index
    %c0_3 = arith.constant 0 : index
    %1 = vector.load %arg3[%c0_1, %c0_2, %c0_3] : memref<1x64x128xf32, #tpu.memory_space<vmem>>, vector<1x64x128xf32>
    %2 = vector.shape_cast %1 : vector<1x64x128xf32> to vector<64x128xf32>
    %cst = arith.constant dense<0.000000e+00> : vector<8x128xf32>
    %3 = tpu.matmul %0, %2, %cst {dimension_numbers = #tpu.dot_dimension_numbers<[1], [0], [0], [1], [0, 0, 1, 1], [], []>} : vector<8x64xf32>, vector<64x128xf32>, vector<8x128xf32> -> vector<8x128xf32>
    %c0_4 = arith.constant 0 : index
    %c0_5 = arith.constant 0 : index
    %c0_6 = arith.constant 0 : index
    %4 = vector.load %arg4[%c0_4, %c0_5, %c0_6] : memref<1x8x128xf32, #tpu.memory_space<vmem>>, vector<1x8x128xf32>
    %5 = vector.shape_cast %4 : vector<1x8x128xf32> to vector<8x128xf32>
    %6 = vector.shape_cast %3 : vector<8x128xf32> to vector<1x8x128xf32>
    tpu.vector_store %arg4[%c0_4, %c0_5, %c0_6], %6 {strides = array<i32>} : memref<1x8x128xf32, #tpu.memory_space<vmem>>, vector<1x8x128xf32>,
    return
  }
  func.func @transform_0(%arg0: i32, %arg1: i32) -> (i32, i32) {
    %c0_i32 = arith.constant 0 : i32
    %c0_i32_0 = arith.constant 0 : i32
    %c0_i32_1 = arith.constant 0 : i32
    return %c0_i32, %c0_i32_0 : i32, i32
  }
  func.func @transform_1(%arg0: i32, %arg1: i32) -> (i32, i32, i32) {
    %c0_i32 = arith.constant 0 : i32
    %c0_i32_0 = arith.constant 0 : i32
    return %arg0, %c0_i32, %arg1 : i32, i32, i32
  }
  func.func @transform_2(%arg0: i32, %arg1: i32) -> (i32, i32, i32) {
    %c0_i32 = arith.constant 0 : i32
    %c0_i32_0 = arith.constant 0 : i32
    return %arg0, %c0_i32, %arg1 : i32, i32, i32
  }
}

</mosaic_0001>

<bundles_post_ra>
// kernel: tpu_custom_call.1
= control target key start
LH: loop header
LB: loop body
LE: loop exit
PB: predicated region body
PF: predicated region fallthrough
CT: control target
= control target key end

     0   :  { %7 = vsyncpa [#allocation3], 0  ;;  %s325_s0 = inlined_call_operand.hbm [shape: f32[8,64], index: 0, kind: input, shape index: {}]   ;;  %s326_s1 = inlined_call_operand.hbm [shape: f32[1,64,128], index: 1, kind: input, shape index: {}]   ;;  %s327_s2 = inlined_call_operand.hbm [shape: f32[1,8,128], index: 2, kind: output, shape index: {}]  }
   0x1   :  { %8 = vsyncpa [#allocation6], 0 }
   0x2   :  { %9 = vsyncpa [#allocation4], 0  ;;  %s259_s9 = smov [#allocation2]   ;;  %s260_s11 = smov [#allocation5]  }
   0x3   :  { %s16_s10 = sshll.u32 %s259_s9, 4  ;;  %s25_s12 = sshll.u32 %s260_s11, 4  ;;  %s17_s10 = int_to_ptr.vmem [resolvable:$true] %s16_s10  ;;  %s282_s12 = int_to_ptr.vmem [resolvable:$true] %s25_s12 }
   0x4   :  { %s187_s15 = scalar_lea.hbm %s325_s0, 128 }
   0x5   :  { %p188_p0 = scmp.ne.s32.totalorder %s325_s0, %s187_s15  ;;  %p191_p1 = scmp.lt.u32.totalorder %s187_s15, %s325_s0 }
   0x7   :  { %p193_p2 = pnand %p191_p1, %p188_p0 }
   0x9   :  { %196 = shalt.err (!%p193_p2)
}
   0xa   :  { %s197_s20 = scalar_lea.vmem %s17_s10, 128  ;;  %p202_p4 = scmp.lt.s32.totalorder %s17_s10, %s17_s10 }
   0xb   :  { %p198_p3 = scmp.ne.s32.totalorder %s17_s10, %s197_s20  ;;  %p203_p5 = scmp.lt.s32.totalorder %s197_s20, %s197_s20 }
   0xd   :  { %p204_p6 = por %p203_p5, %p202_p4 }
   0xf   :  { %p205_p7 = pnand %p204_p6, %p198_p3 }
  0x11   :  { %208 = shalt.err (!%p205_p7)
}
  0x12   :  { %19 = dma.hbm_to_vmem [thread:$0]  %s325_s0, 128, %s17_s10, [#allocation3]  }
  0x13   :  { %s209_s25 = scalar_lea.hbm %s326_s1, 1024 }
  0x14   :  { %p210_p8 = scmp.ne.s32.totalorder %s326_s1, %s209_s25  ;;  %p213_p9 = scmp.lt.u32.totalorder %s209_s25, %s326_s1 }
  0x16   :  { %p215_p10 = pnand %p213_p9, %p210_p8 }
  0x18   :  { %218 = shalt.err (!%p215_p10)
}
  0x19   :  { %s219_s30 = scalar_lea.vmem %s282_s12, 1024  ;;  %p224_p12 = scmp.lt.s32.totalorder %s282_s12, %s282_s12 }
  0x1a   :  { %p220_p11 = scmp.ne.s32.totalorder %s282_s12, %s219_s30  ;;  %p225_p13 = scmp.lt.s32.totalorder %s219_s30, %s219_s30 }
  0x1c   :  { %p226_p0 = por %p225_p13, %p224_p12 }
  0x1e   :  { %p227_p1 = pnand %p226_p0, %p220_p11 }
  0x20   :  { %230 = shalt.err (!%p227_p1)
}
  0x21   :  { %s261_s0 = smov 128   ;;  %s262_s3 = smov 8  }
  0x22   :  { %31 = dma.hbm_to_vmem [thread:$0]  %s326_s1, 1024, %s282_s12, [#allocation6], %s261_s0, %s261_s0, %s262_s3  }
  0x23   :  { %253 = dma.done.wait [#allocation3], 128  }
  0x24   :  { %254 = vsyncadd [#allocation3], 4294967168 }
  0x25   :  { %255 = dma.done.wait [#allocation6], 1024  }
  0x26   :  { %256 = vsyncadd [#allocation6], 4294966272  ;;  %v263_v0 = vmov 0.0|0.0   ;;  %vm264_vm0 = vmmov 0   ;;  %v265_v1 = vmov 0.0   ;;  %v39_v2 = vld [vmem:[#allocation5] sm:$0xff] }
  0x27   :  { %167 = vmatprep.subr.bf16.mxu0 %v263_v0  ;;  %164 = vmatprep.mubr.msk.f32.mxu0 %vm264_vm0, %v265_v1  ;;  %v40_v3 = vld [vmem:[#allocation5 + $0x8] sm:$0xff]  ;;  %v41_v4 = vld [vmem:[#allocation5 + $0x10] sm:$0xff]  ;;  %v42_v6 = vld [vmem:[#allocation5 + $0x18] sm:$0xff]  ;;  %vm47_vm1 = vcmask 523264   ;;  %s266_s1 = smov [#allocation7]  }
  0x28   :  { %v168_v5 = vpack.c.bf16 %v40_v3, %v39_v2  ;;  %v171_v7 = vpack.c.bf16 %v42_v6, %v41_v4  ;;  %v43_v8 = vld [vmem:[#allocation5 + $0x20] sm:$0xff]  ;;  %v44_v9 = vld [vmem:[#allocation5 + $0x28] sm:$0xff]  ;;  %v45_v11 = vld [vmem:[#allocation5 + $0x30] sm:$0xff]  ;;  %s128_s6 = sshll.u32 %s266_s1, 4  ;;  %s129_s6 = int_to_ptr.vmem [resolvable:$true] %s128_s6 }
  0x29   :  { %v174_v10 = vpack.c.bf16 %v44_v9, %v43_v8  ;;  %v46_v12 = vld [vmem:[#allocation5 + $0x38] sm:$0xff]  ;;  %s231_s7 = scalar_lea.vmem %s129_s6, 128  ;;  %p236_p3 = scmp.lt.s32.totalorder %s129_s6, %s129_s6 }
  0x2a   :  { %169 = vmatpush3.bf16.msra.mxu0 %v168_v5  ;;  %v177_v13 = vpack.c.bf16 %v46_v12, %v45_v11  ;;  %v38_v14 = vld [vmem:[#allocation2] sm:$0xff]  ;;  %p232_p2 = scmp.ne.s32.totalorder %s129_s6, %s231_s7  ;;  %p237_p4 = scmp.lt.s32.totalorder %s231_s7, %s231_s7 }
  0x2b   :  { %170 = vmatprep.subr.bf16.mxu0 %v263_v0 }
  0x2c   :  { %p238_p5 = por %p237_p4, %p236_p3 }
  0x2e   :  { %172 = vmatpush3.bf16.msra.mxu0 %v171_v7  ;;  %p239_p6 = pnand %p238_p5, %p232_p2 }
  0x2f   :  { %173 = vmatprep.subr.bf16.mxu0 %v263_v0 }
  0x32   :  { %175 = vmatpush3.bf16.msra.mxu0 %v174_v10 }
  0x33   :  { %176 = vmatprep.subr.bf16.mxu0 %v263_v0 }
  0x36   :  { %178 = vmatpush3.bf16.msra.mxu0 %v177_v13 }
  0x39   :  { %165 = vmatmul.mubr.msk.f32.vlgmr.msra.gmra.mrb[0].mxu0 %vm47_vm1, %v38_v14 }
 0x10c   :  { %v117_v15 = vpop.f32.mrb[0].mxu0 }
 0x10d   :  { %121 = vst [vmem:[#allocation7] sm:$0xff] %v117_v15  ;;  %v166_v16 = vpop.f32.mrb[1].mxu0 }
 0x10e   :  { %242 = shalt.err (!%p239_p6)
}
 0x10f   :  { %s243_s10 = scalar_lea.hbm %s327_s2, 128 }
 0x110   :  { %p244_p7 = scmp.ne.s32.totalorder %s327_s2, %s243_s10  ;;  %p247_p8 = scmp.lt.u32.totalorder %s243_s10, %s327_s2 }
 0x112   :  { %p249_p9 = pnand %p247_p8, %p244_p7 }
 0x114   :  { %252 = shalt.err (!%p249_p9)
}
 0x115   :  { %131 = dma.vmem_to_hbm [thread:$0]  %s129_s6, 128, %s327_s2, [#allocation4]  }
 0x116   :  { %257 = dma.done.wait [#allocation4], 128  }
 0x117   :  { %258 = vsyncadd [#allocation4], 4294967168 }
 0x118   :  { %135 = vsyncpa [#allocation3], 1 }
 0x119   :  { %136 = vsyncpa [#allocation6], 1 }
 0x11a   :  { %137 = vsyncpa [#allocation4], 1 }

// kernel: tpu_custom_call.1
= control target key start
LH: loop header
LB: loop body
LE: loop exit
PB: predicated region body
PF: predicated region fallthrough
CT: control target
= control target key end

     0   :  { %7 = vsyncpa [#allocation3], 0  ;;  %s325_s0 = inlined_call_operand.hbm [shape: f32[8,64], index: 0, kind: input, shape index: {}]   ;;  %s326_s1 = inlined_call_operand.hbm [shape: f32[1,64,128], index: 1, kind: input, shape index: {}]   ;;  %s327_s2 = inlined_call_operand.hbm [shape: f32[1,8,128], index: 2, kind: output, shape index: {}]  }
   0x1   :  { %8 = vsyncpa [#allocation6], 0 }
   0x2   :  { %9 = vsyncpa [#allocation4], 0  ;;  %s259_s9 = smov [#allocation2]   ;;  %s260_s11 = smov [#allocation5]  }
   0x3   :  { %s16_s10 = sshll.u32 %s259_s9, 4  ;;  %s25_s12 = sshll.u32 %s260_s11, 4  ;;  %s17_s10 = int_to_ptr.vmem [resolvable:$true] %s16_s10  ;;  %s282_s12 = int_to_ptr.vmem [resolvable:$true] %s25_s12 }
   0x4   :  { %s187_s15 = scalar_lea.hbm %s325_s0, 128 }
   0x5   :  { %p188_p0 = scmp.ne.s32.totalorder %s325_s0, %s187_s15  ;;  %p191_p1 = scmp.lt.u32.totalorder %s187_s15, %s325_s0 }
   0x7   :  { %p193_p2 = pnand %p191_p1, %p188_p0 }
   0x9   :  { %196 = shalt.err (!%p193_p2)
}
   0xa   :  { %s197_s20 = scalar_lea.vmem %s17_s10, 128  ;;  %p202_p4 = scmp.lt.s32.totalorder %s17_s10, %s17_s10 }
   0xb   :  { %p198_p3 = scmp.ne.s32.totalorder %s17_s10, %s197_s20  ;;  %p203_p5 = scmp.lt.s32.totalorder %s197_s20, %s197_s20 }
   0xd   :  { %p204_p6 = por %p203_p5, %p202_p4 }
   0xf   :  { %p205_p7 = pnand %p204_p6, %p198_p3 }
  0x11   :  { %208 = shalt.err (!%p205_p7)
}
  0x12   :  { %19 = dma.hbm_to_vmem [thread:$0]  %s325_s0, 128, %s17_s10, [#allocation3]  }
  0x13   :  { %s209_s25 = scalar_lea.hbm %s326_s1, 1024 }
  0x14   :  { %p210_p8 = scmp.ne.s32.totalorder %s326_s1, %s209_s25  ;;  %p213_p9 = scmp.lt.u32.totalorder %s209_s25, %s326_s1 }
  0x16   :  { %p215_p10 = pnand %p213_p9, %p210_p8 }
  0x18   :  { %218 = shalt.err (!%p215_p10)
}
  0x19   :  { %s219_s30 = scalar_lea.vmem %s282_s12, 1024  ;;  %p224_p12 = scmp.lt.s32.totalorder %s282_s12, %s282_s12 }
  0x1a   :  { %p220_p11 = scmp.ne.s32.totalorder %s282_s12, %s219_s30  ;;  %p225_p13 = scmp.lt.s32.totalorder %s219_s30, %s219_s30 }
  0x1c   :  { %p226_p0 = por %p225_p13, %p224_p12 }
  0x1e   :  { %p227_p1 = pnand %p226_p0, %p220_p11 }
  0x20   :  { %230 = shalt.err (!%p227_p1)
}
  0x21   :  { %s261_s0 = smov 128   ;;  %s262_s3 = smov 8  }
  0x22   :  { %31 = dma.hbm_to_vmem [thread:$0]  %s326_s1, 1024, %s282_s12, [#allocation6], %s261_s0, %s261_s0, %s262_s3  }
  0x23   :  { %253 = dma.done.wait [#allocation3], 128  }
  0x24   :  { %254 = vsyncadd [#allocation3], 4294967168 }
  0x25   :  { %255 = dma.done.wait [#allocation6], 1024  }
  0x26   :  { %256 = vsyncadd [#allocation6], 4294966272  ;;  %v263_v0 = vmov 0.0|0.0   ;;  %vm264_vm0 = vmmov 0   ;;  %v265_v1 = vmov 0.0   ;;  %v39_v2 = vld [vmem:[#allocation5] sm:$0xff] }
  0x27   :  { %167 = vmatprep.subr.bf16.mxu0 %v263_v0  ;;  %164 = vmatprep.mubr.msk.f32.mxu0 %vm264_vm0, %v265_v1  ;;  %v40_v3 = vld [vmem:[#allocation5 + $0x8] sm:$0xff]  ;;  %v41_v4 = vld [vmem:[#allocation5 + $0x10] sm:$0xff]  ;;  %v42_v6 = vld [vmem:[#allocation5 + $0x18] sm:$0xff]  ;;  %vm47_vm1 = vcmask 523264   ;;  %s266_s1 = smov [#allocation7]  }
  0x28   :  { %v168_v5 = vpack.c.bf16 %v40_v3, %v39_v2  ;;  %v171_v7 = vpack.c.bf16 %v42_v6, %v41_v4  ;;  %v43_v8 = vld [vmem:[#allocation5 + $0x20] sm:$0xff]  ;;  %v44_v9 = vld [vmem:[#allocation5 + $0x28] sm:$0xff]  ;;  %v45_v11 = vld [vmem:[#allocation5 + $0x30] sm:$0xff]  ;;  %s128_s6 = sshll.u32 %s266_s1, 4  ;;  %s129_s6 = int_to_ptr.vmem [resolvable:$true] %s128_s6 }
  0x29   :  { %v174_v10 = vpack.c.bf16 %v44_v9, %v43_v8  ;;  %v46_v12 = vld [vmem:[#allocation5 + $0x38] sm:$0xff]  ;;  %s231_s7 = scalar_lea.vmem %s129_s6, 128  ;;  %p236_p3 = scmp.lt.s32.totalorder %s129_s6, %s129_s6 }
  0x2a   :  { %169 = vmatpush3.bf16.msra.mxu0 %v168_v5  ;;  %v177_v13 = vpack.c.bf16 %v46_v12, %v45_v11  ;;  %v38_v14 = vld [vmem:[#allocation2] sm:$0xff]  ;;  %p232_p2 = scmp.ne.s32.totalorder %s129_s6, %s231_s7  ;;  %p237_p4 = scmp.lt.s32.totalorder %s231_s7, %s231_s7 }
  0x2b   :  { %170 = vmatprep.subr.bf16.mxu0 %v263_v0 }
  0x2c   :  { %p238_p5 = por %p237_p4, %p236_p3 }
  0x2e   :  { %172 = vmatpush3.bf16.msra.mxu0 %v171_v7  ;;  %p239_p6 = pnand %p238_p5, %p232_p2 }
  0x2f   :  { %173 = vmatprep.subr.bf16.mxu0 %v263_v0 }
  0x32   :  { %175 = vmatpush3.bf16.msra.mxu0 %v174_v10 }
  0x33   :  { %176 = vmatprep.subr.bf16.mxu0 %v263_v0 }
  0x36   :  { %178 = vmatpush3.bf16.msra.mxu0 %v177_v13 }
  0x39   :  { %165 = vmatmul.mubr.msk.f32.vlgmr.msra.gmra.mrb[0].mxu0 %vm47_vm1, %v38_v14 }
 0x10c   :  { %v117_v15 = vpop.f32.mrb[0].mxu0 }
 0x10d   :  { %121 = vst [vmem:[#allocation7] sm:$0xff] %v117_v15  ;;  %v166_v16 = vpop.f32.mrb[1].mxu0 }
 0x10e   :  { %242 = shalt.err (!%p239_p6)
}
 0x10f   :  { %s243_s10 = scalar_lea.hbm %s327_s2, 128 }
 0x110   :  { %p244_p7 = scmp.ne.s32.totalorder %s327_s2, %s243_s10  ;;  %p247_p8 = scmp.lt.u32.totalorder %s243_s10, %s327_s2 }
 0x112   :  { %p249_p9 = pnand %p247_p8, %p244_p7 }
 0x114   :  { %252 = shalt.err (!%p249_p9)
}
 0x115   :  { %131 = dma.vmem_to_hbm [thread:$0]  %s129_s6, 128, %s327_s2, [#allocation4]  }
 0x116   :  { %257 = dma.done.wait [#allocation4], 128  }
 0x117   :  { %258 = vsyncadd [#allocation4], 4294967168 }
 0x118   :  { %135 = vsyncpa [#allocation3], 1 }
 0x119   :  { %136 = vsyncpa [#allocation6], 1 }
 0x11a   :  { %137 = vsyncpa [#allocation4], 1 }

</bundles_post_ra>
